<compile_context>
chip_gen: v7x
topology: tpu7x:2x2x1
jax: 0.10.0
libtpu: 0.0.40
codegen_flags: <defaults>
</compile_context>

<pallas_src>
import jax
import jax.numpy as jnp
from jax.experimental import pallas as pl
from jax.experimental.pallas import tpu as pltpu


def _boxes_loss_kernel(slab_ref, out_ref):
    """slab_ref: (8, R, 128) f32 — planes 0..3 = src cx,cy,w,h ; 4..7 = tgt.

    out_ref: (1, 2) f32 in SMEM — [l1_sum, giou_loss_sum].
    """
    s_cx = slab_ref[0]                                        # (R, 128) dense
    s_cy = slab_ref[1]
    s_w = slab_ref[2]
    s_h = slab_ref[3]
    t_cx = slab_ref[4]
    t_cy = slab_ref[5]
    t_w = slab_ref[6]
    t_h = slab_ref[7]

    # ---- L1 loss on raw cxcywh boxes (== F.l1_loss reduction='none', summed) ----
    l1 = (jnp.abs(s_cx - t_cx) + jnp.abs(s_cy - t_cy)
          + jnp.abs(s_w - t_w) + jnp.abs(s_h - t_h))          # (R, 128)

    # ---- GIoU: cxcywh -> xyxy (half-extents hoisted) ----
    s_hw = 0.5 * s_w
    s_hh = 0.5 * s_h
    t_hw = 0.5 * t_w
    t_hh = 0.5 * t_h
    s_x0 = s_cx - s_hw
    s_x1 = s_cx + s_hw
    s_y0 = s_cy - s_hh
    s_y1 = s_cy + s_hh
    t_x0 = t_cx - t_hw
    t_x1 = t_cx + t_hw
    t_y0 = t_cy - t_hh
    t_y1 = t_cy + t_hh

    area_s = (s_x1 - s_x0) * (s_y1 - s_y0)
    area_t = (t_x1 - t_x0) * (t_y1 - t_y0)

    iw = jnp.maximum(jnp.minimum(s_x1, t_x1) - jnp.maximum(s_x0, t_x0), 0.0)
    ih = jnp.maximum(jnp.minimum(s_y1, t_y1) - jnp.maximum(s_y0, t_y0), 0.0)
    inter = iw * ih
    union = area_s + area_t - inter
    # EUP reciprocal instead of VALU-path divide (exact for 1e-5 tolerance).
    iou = inter * pl.reciprocal(union)

    # Enclosing box (clamp matches DETR box_ops.generalized_box_iou).
    ew = jnp.maximum(jnp.maximum(s_x1, t_x1) - jnp.minimum(s_x0, t_x0), 0.0)
    eh = jnp.maximum(jnp.maximum(s_y1, t_y1) - jnp.minimum(s_y0, t_y0), 0.0)
    enclose = ew * eh
    giou = iou - (enclose - union) * pl.reciprocal(enclose)

    out_ref[0, 0] = jnp.sum(l1)
    out_ref[0, 1] = jnp.sum(1.0 - giou)


def _boxes_loss_sums(slab):
    """slab: (8, R, 128) f32 with R % 8 == 0. Returns (1, 2) [l1_sum, giou_sum]."""
    _, r, _ = slab.shape
    return pl.pallas_call(
        _boxes_loss_kernel,
        out_shape=jax.ShapeDtypeStruct((1, 2), jnp.float32),
        grid_spec=pltpu.PrefetchScalarGridSpec(
            num_scalar_prefetch=0,
            grid=(1,),  # single step: whole slab fits VMEM for realistic N
            in_specs=[pl.BlockSpec((8, r, 128), lambda i: (0, 0, 0))],
            out_specs=pl.BlockSpec((1, 2), lambda i: (0, 0),
                                   memory_space=pltpu.SMEM),
        ),
        compiler_params=pltpu.CompilerParams(
            dimension_semantics=("arbitrary",)),
    )(slab)


def boxes_loss_forward(pred_boxes, targets, indices, num_boxes):
    """Mirrors BoxesLoss.forward: returns {'loss_bbox': scalar, 'loss_giou': scalar}."""
    # _get_src_permutation_idx + gathers (cheap ragged glue, plain JAX)
    batch_idx = jnp.concatenate(
        [jnp.full_like(src, i) for i, (src, _) in enumerate(indices)])
    src_idx = jnp.concatenate([src for src, _ in indices])
    src_boxes = pred_boxes[batch_idx, src_idx].astype(jnp.float32)        # (N, 4)
    target_boxes = jnp.concatenate(
        [t["boxes"][j] for t, (_, j) in zip(targets, indices)],
        axis=0).astype(jnp.float32)                                        # (N, 4)

    n = src_boxes.shape[0]
    # Pad to a multiple of 1024 pairs so the (R, 128) plane has R % 8 == 0.
    npad = max(1024, ((n + 1023) // 1024) * 1024)
    r = npad // 128

    # Neutral pad pair: identical unit boxes -> L1 = 0, 1 - GIoU = 0 exactly.
    pad_box = jnp.array([0.5, 0.5, 1.0, 1.0], dtype=jnp.float32)

    def to_planes(boxes):  # (N, 4) -> (4, R, 128) coordinate planes
        pad = jnp.broadcast_to(pad_box, (npad - n, 4))
        full = jnp.concatenate([boxes, pad], axis=0)                       # (npad, 4)
        return full.T.reshape(4, r, 128)

    slab = jnp.concatenate([to_planes(src_boxes), to_planes(target_boxes)],
                           axis=0)                                         # (8, R, 128)

    sums = _boxes_loss_sums(slab)
    inv_nb = 1.0 / jnp.float32(num_boxes)
    return {"loss_bbox": sums[0, 0] * inv_nb,
            "loss_giou": sums[0, 1] * inv_nb}


def _ref_boxes_loss(pred_boxes, targets, indices, num_boxes):
    """Pure-JAX reference mirroring the PyTorch module."""
    batch_idx = jnp.concatenate(
        [jnp.full_like(s, i) for i, (s, _) in enumerate(indices)])
    src_idx = jnp.concatenate([s for s, _ in indices])
    src = pred_boxes[batch_idx, src_idx].astype(jnp.float32)
    tgt = jnp.concatenate([t["boxes"][j] for t, (_, j) in zip(targets, indices)],
                          axis=0).astype(jnp.float32)

    loss_bbox = jnp.abs(src - tgt).sum() / num_boxes

    def xyxy(b):
        cx, cy, w, h = b[:, 0], b[:, 1], b[:, 2], b[:, 3]
        return jnp.stack([cx - 0.5 * w, cy - 0.5 * h, cx + 0.5 * w, cy + 0.5 * h], -1)

    s, t = xyxy(src), xyxy(tgt)
    area_s = (s[:, 2] - s[:, 0]) * (s[:, 3] - s[:, 1])
    area_t = (t[:, 2] - t[:, 0]) * (t[:, 3] - t[:, 1])
    iw = jnp.maximum(jnp.minimum(s[:, 2], t[:, 2]) - jnp.maximum(s[:, 0], t[:, 0]), 0.0)
    ih = jnp.maximum(jnp.minimum(s[:, 3], t[:, 3]) - jnp.maximum(s[:, 1], t[:, 1]), 0.0)
    inter = iw * ih
    union = area_s + area_t - inter
    iou = inter / union
    ew = jnp.maximum(s[:, 2], t[:, 2]) - jnp.minimum(s[:, 0], t[:, 0])
    eh = jnp.maximum(s[:, 3], t[:, 3]) - jnp.minimum(s[:, 1], t[:, 1])
    giou = iou - (ew * eh - union) / (ew * eh)
    loss_giou = (1.0 - giou).sum() / num_boxes
    return loss_bbox, loss_giou


if __name__ == "__main__":
    key = jax.random.PRNGKey(0)
    B, Q = 2, 8
    k_pred, k_b0, k_b1 = jax.random.split(key, 3)

    # DETR-style boxes in cxcywh, components in (0, 1) with positive w, h.
    pred_boxes = jax.random.uniform(k_pred, (B, Q, 4), dtype=jnp.float32,
                                    minval=0.1, maxval=0.9)
    targets = [
        {"boxes": jax.random.uniform(k_b0, (3, 4), dtype=jnp.float32,
                                     minval=0.1, maxval=0.9)},
        {"boxes": jax.random.uniform(k_b1, (5, 4), dtype=jnp.float32,
                                     minval=0.1, maxval=0.9)},
    ]
    # matcher indices: (query indices, target-box indices) per image
    indices = [
        (jnp.array([1, 4, 6], dtype=jnp.int32), jnp.array([2, 0, 1], dtype=jnp.int32)),
        (jnp.array([0, 3, 5, 7, 2], dtype=jnp.int32), jnp.array([4, 1, 0, 3, 2], dtype=jnp.int32)),
    ]
    num_boxes = 8.0

    losses = boxes_loss_forward(pred_boxes, targets, indices, num_boxes)
    loss_bbox = jax.block_until_ready(losses["loss_bbox"])
    loss_giou = jax.block_until_ready(losses["loss_giou"])

    ref_bbox, ref_giou = _ref_boxes_loss(pred_boxes, targets, indices, num_boxes)
    assert jnp.allclose(loss_bbox, ref_bbox, rtol=1e-5, atol=1e-5), (loss_bbox, ref_bbox)
    assert jnp.allclose(loss_giou, ref_giou, rtol=1e-5, atol=1e-5), (loss_giou, ref_giou)

    print("KERNEL_OK")
</pallas_src>

<mosaic_0001>
module attributes {stable_mosaic.version = 11 : i64} {
  func.func @_boxes_loss_kernel(%arg0: i32, %arg1: memref<8x8x128xf32, #tpu.memory_space<vmem>>, %arg2: memref<1x2xf32, #tpu.memory_space<smem>>) attributes {dimension_semantics = [#tpu.dimension_semantics<arbitrary>], iteration_bounds = array<i64: 1>, scalar_prefetch = 0 : i64, scratch_operands = 0 : i64, tpu.core_type = #tpu.core_type<tc>, window_params = [{pipeline_mode = #tpu.pipeline_mode<synchronous>, transform_indices = @transform_0, window_bounds = array<i64: 8, 8, 128>}, {transform_indices = @transform_1, window_bounds = array<i64: 1, 2>}]} {
    %c0 = arith.constant 0 : index
    %c0_0 = arith.constant 0 : index
    %c0_1 = arith.constant 0 : index
    %0 = vector.load %arg1[%c0, %c0_0, %c0_1] : memref<8x8x128xf32, #tpu.memory_space<vmem>>, vector<1x8x128xf32>
    %1 = vector.shape_cast %0 : vector<1x8x128xf32> to vector<8x128xf32>
    %c1 = arith.constant 1 : index
    %c0_2 = arith.constant 0 : index
    %c0_3 = arith.constant 0 : index
    %2 = vector.load %arg1[%c1, %c0_2, %c0_3] : memref<8x8x128xf32, #tpu.memory_space<vmem>>, vector<1x8x128xf32>
    %3 = vector.shape_cast %2 : vector<1x8x128xf32> to vector<8x128xf32>
    %c2 = arith.constant 2 : index
    %c0_4 = arith.constant 0 : index
    %c0_5 = arith.constant 0 : index
    %4 = vector.load %arg1[%c2, %c0_4, %c0_5] : memref<8x8x128xf32, #tpu.memory_space<vmem>>, vector<1x8x128xf32>
    %5 = vector.shape_cast %4 : vector<1x8x128xf32> to vector<8x128xf32>
    %c3 = arith.constant 3 : index
    %c0_6 = arith.constant 0 : index
    %c0_7 = arith.constant 0 : index
    %6 = vector.load %arg1[%c3, %c0_6, %c0_7] : memref<8x8x128xf32, #tpu.memory_space<vmem>>, vector<1x8x128xf32>
    %7 = vector.shape_cast %6 : vector<1x8x128xf32> to vector<8x128xf32>
    %c4 = arith.constant 4 : index
    %c0_8 = arith.constant 0 : index
    %c0_9 = arith.constant 0 : index
    %8 = vector.load %arg1[%c4, %c0_8, %c0_9] : memref<8x8x128xf32, #tpu.memory_space<vmem>>, vector<1x8x128xf32>
    %9 = vector.shape_cast %8 : vector<1x8x128xf32> to vector<8x128xf32>
    %c5 = arith.constant 5 : index
    %c0_10 = arith.constant 0 : index
    %c0_11 = arith.constant 0 : index
    %10 = vector.load %arg1[%c5, %c0_10, %c0_11] : memref<8x8x128xf32, #tpu.memory_space<vmem>>, vector<1x8x128xf32>
    %11 = vector.shape_cast %10 : vector<1x8x128xf32> to vector<8x128xf32>
    %c6 = arith.constant 6 : index
    %c0_12 = arith.constant 0 : index
    %c0_13 = arith.constant 0 : index
    %12 = vector.load %arg1[%c6, %c0_12, %c0_13] : memref<8x8x128xf32, #tpu.memory_space<vmem>>, vector<1x8x128xf32>
    %13 = vector.shape_cast %12 : vector<1x8x128xf32> to vector<8x128xf32>
    %c7 = arith.constant 7 : index
    %c0_14 = arith.constant 0 : index
    %c0_15 = arith.constant 0 : index
    %14 = vector.load %arg1[%c7, %c0_14, %c0_15] : memref<8x8x128xf32, #tpu.memory_space<vmem>>, vector<1x8x128xf32>
    %15 = vector.shape_cast %14 : vector<1x8x128xf32> to vector<8x128xf32>
    %16 = arith.subf %1, %9 : vector<8x128xf32>
    %17 = math.absf %16 : vector<8x128xf32>
    %18 = arith.subf %3, %11 : vector<8x128xf32>
    %19 = math.absf %18 : vector<8x128xf32>
    %20 = arith.addf %17, %19 : vector<8x128xf32>
    %21 = arith.subf %5, %13 : vector<8x128xf32>
    %22 = math.absf %21 : vector<8x128xf32>
    %23 = arith.addf %20, %22 : vector<8x128xf32>
    %24 = arith.subf %7, %15 : vector<8x128xf32>
    %25 = math.absf %24 : vector<8x128xf32>
    %26 = arith.addf %23, %25 : vector<8x128xf32>
    %cst = arith.constant 5.000000e-01 : f32
    %27 = vector.broadcast %cst : f32 to vector<8x128xf32>
    %28 = arith.mulf %27, %5 : vector<8x128xf32>
    %cst_16 = arith.constant 5.000000e-01 : f32
    %29 = vector.broadcast %cst_16 : f32 to vector<8x128xf32>
    %30 = arith.mulf %29, %7 : vector<8x128xf32>
    %cst_17 = arith.constant 5.000000e-01 : f32
    %31 = vector.broadcast %cst_17 : f32 to vector<8x128xf32>
    %32 = arith.mulf %31, %13 : vector<8x128xf32>
    %cst_18 = arith.constant 5.000000e-01 : f32
    %33 = vector.broadcast %cst_18 : f32 to vector<8x128xf32>
    %34 = arith.mulf %33, %15 : vector<8x128xf32>
    %35 = arith.subf %1, %28 : vector<8x128xf32>
    %36 = arith.addf %1, %28 : vector<8x128xf32>
    %37 = arith.subf %3, %30 : vector<8x128xf32>
    %38 = arith.addf %3, %30 : vector<8x128xf32>
    %39 = arith.subf %9, %32 : vector<8x128xf32>
    %40 = arith.addf %9, %32 : vector<8x128xf32>
    %41 = arith.subf %11, %34 : vector<8x128xf32>
    %42 = arith.addf %11, %34 : vector<8x128xf32>
    %43 = arith.subf %36, %35 : vector<8x128xf32>
    %44 = arith.subf %38, %37 : vector<8x128xf32>
    %45 = arith.mulf %43, %44 : vector<8x128xf32>
    %46 = arith.subf %40, %39 : vector<8x128xf32>
    %47 = arith.subf %42, %41 : vector<8x128xf32>
    %48 = arith.mulf %46, %47 : vector<8x128xf32>
    %49 = arith.minimumf %36, %40 : vector<8x128xf32>
    %50 = arith.maximumf %35, %39 : vector<8x128xf32>
    %51 = arith.subf %49, %50 : vector<8x128xf32>
    %cst_19 = arith.constant 0.000000e+00 : f32
    %52 = vector.broadcast %cst_19 : f32 to vector<8x128xf32>
    %53 = arith.maximumf %51, %52 : vector<8x128xf32>
    %54 = arith.minimumf %38, %42 : vector<8x128xf32>
    %55 = arith.maximumf %37, %41 : vector<8x128xf32>
    %56 = arith.subf %54, %55 : vector<8x128xf32>
    %cst_20 = arith.constant 0.000000e+00 : f32
    %57 = vector.broadcast %cst_20 : f32 to vector<8x128xf32>
    %58 = arith.maximumf %56, %57 : vector<8x128xf32>
    %59 = arith.mulf %53, %58 : vector<8x128xf32>
    %60 = arith.addf %45, %48 : vector<8x128xf32>
    %61 = arith.subf %60, %59 : vector<8x128xf32>
    %62 = tpu.reciprocal %61 : vector<8x128xf32> -> vector<8x128xf32>
    %63 = arith.mulf %59, %62 : vector<8x128xf32>
    %64 = arith.maximumf %36, %40 : vector<8x128xf32>
    %65 = arith.minimumf %35, %39 : vector<8x128xf32>
    %66 = arith.subf %64, %65 : vector<8x128xf32>
    %cst_21 = arith.constant 0.000000e+00 : f32
    %67 = vector.broadcast %cst_21 : f32 to vector<8x128xf32>
    %68 = arith.maximumf %66, %67 : vector<8x128xf32>
    %69 = arith.maximumf %38, %42 : vector<8x128xf32>
    %70 = arith.minimumf %37, %41 : vector<8x128xf32>
    %71 = arith.subf %69, %70 : vector<8x128xf32>
    %cst_22 = arith.constant 0.000000e+00 : f32
    %72 = vector.broadcast %cst_22 : f32 to vector<8x128xf32>
    %73 = arith.maximumf %71, %72 : vector<8x128xf32>
    %74 = arith.mulf %68, %73 : vector<8x128xf32>
    %75 = arith.subf %74, %61 : vector<8x128xf32>
    %76 = tpu.reciprocal %74 : vector<8x128xf32> -> vector<8x128xf32>
    %77 = arith.mulf %75, %76 : vector<8x128xf32>
    %78 = arith.subf %63, %77 : vector<8x128xf32>
    %79 = vector.shape_cast %26 : vector<8x128xf32> to vector<1x8x128xf32>
    %cst_23 = arith.constant dense<0.000000e+00> : vector<1xf32>
    %80 = vector.multi_reduction <add>, %79, %cst_23 [1, 2] : vector<1x8x128xf32> to vector<1xf32>
    %81 = vector.shape_cast %80 : vector<1xf32> to vector<1x1x1xf32>
    %82 = vector.extract %81[0, 0, 0] : f32 from vector<1x1x1xf32>
    %c0_24 = arith.constant 0 : index
    %c0_25 = arith.constant 0 : index
    %83 = memref.load %arg2[%c0_24, %c0_25] : memref<1x2xf32, #tpu.memory_space<smem>>
    memref.store %82, %arg2[%c0_24, %c0_25] : memref<1x2xf32, #tpu.memory_space<smem>>
    %cst_26 = arith.constant 1.000000e+00 : f32
    %84 = vector.broadcast %cst_26 : f32 to vector<8x128xf32>
    %85 = arith.subf %84, %78 : vector<8x128xf32>
    %86 = vector.shape_cast %85 : vector<8x128xf32> to vector<1x8x128xf32>
    %cst_27 = arith.constant dense<0.000000e+00> : vector<1xf32>
    %87 = vector.multi_reduction <add>, %86, %cst_27 [1, 2] : vector<1x8x128xf32> to vector<1xf32>
    %88 = vector.shape_cast %87 : vector<1xf32> to vector<1x1x1xf32>
    %89 = vector.extract %88[0, 0, 0] : f32 from vector<1x1x1xf32>
    %c0_28 = arith.constant 0 : index
    %c1_29 = arith.constant 1 : index
    %90 = memref.load %arg2[%c0_28, %c1_29] : memref<1x2xf32, #tpu.memory_space<smem>>
    memref.store %89, %arg2[%c0_28, %c1_29] : memref<1x2xf32, #tpu.memory_space<smem>>
    return
  }
  func.func @transform_0(%arg0: i32) -> (i32, i32, i32) {
    %c0_i32 = arith.constant 0 : i32
    %c0_i32_0 = arith.constant 0 : i32
    %c0_i32_1 = arith.constant 0 : i32
    %c0_i32_2 = arith.constant 0 : i32
    return %c0_i32, %c0_i32_0, %c0_i32_1 : i32, i32, i32
  }
  func.func @transform_1(%arg0: i32) -> (i32, i32) {
    %c0_i32 = arith.constant 0 : i32
    %c0_i32_0 = arith.constant 0 : i32
    %c0_i32_1 = arith.constant 0 : i32
    return %c0_i32, %c0_i32_0 : i32, i32
  }
}

</mosaic_0001>

<bundles_post_ra>
// kernel: tpu_custom_call.1
= control target key start
LH: loop header
LB: loop body
LE: loop exit
PB: predicated region body
PF: predicated region fallthrough
CT: control target
= control target key end

     0   :  { %6 = vsyncpa [#allocation3], 0  ;;  %s216_s0 = inlined_call_operand.hbm [shape: f32[8,8,128], index: 0, kind: input, shape index: {}]   ;;  %s217_s1 = inlined_call_operand.hbm [shape: f32[1,2], index: 1, kind: output, shape index: {}]  }
   0x1   :  { %7 = vsyncpa [#allocation4], 0  ;;  %s178_s6 = smov [#allocation2]   ;;  %s142_s10 = scalar_lea.hbm %s216_s0, 1024 }
   0x2   :  { %s13_s7 = sshll.u32 %s178_s6, 4  ;;  %p143_p0 = scmp.ne.s32.totalorder %s216_s0, %s142_s10  ;;  %s14_s7 = int_to_ptr.vmem [resolvable:$true] %s13_s7 }
   0x3   :  { %p146_p1 = scmp.lt.u32.totalorder %s142_s10, %s216_s0 }
   0x5   :  { %p148_p2 = pnand %p146_p1, %p143_p0 }
   0x7   :  { %151 = shalt.err (!%p148_p2)
}
   0x8   :  { %s152_s15 = scalar_lea.vmem %s14_s7, 1024  ;;  %p157_p4 = scmp.lt.s32.totalorder %s14_s7, %s14_s7 }
   0x9   :  { %p153_p3 = scmp.ne.s32.totalorder %s14_s7, %s152_s15  ;;  %p158_p5 = scmp.lt.s32.totalorder %s152_s15, %s152_s15 }
   0xb   :  { %p159_p6 = por %p158_p5, %p157_p4 }
   0xd   :  { %p160_p7 = pnand %p159_p6, %p153_p3 }
   0xf   :  { %163 = shalt.err (!%p160_p7)
}
  0x10   :  { %s179_s16 = smov 128   ;;  %s180_s17 = smov 8  }
  0x11   :  { %19 = dma.hbm_to_vmem [thread:$0]  %s216_s0, 1024, %s14_s7, [#allocation3], %s179_s16, %s179_s16, %s180_s17  }
  0x12   :  { %174 = dma.done.wait [#allocation3], 1024  }
  0x13   :  { %175 = vsyncadd [#allocation3], 4294966272  ;;  %v23_v0 = vld [vmem:[#allocation2] sm:$0xff]  ;;  %v25_v1 = vld [vmem:[#allocation2 + $0x8] sm:$0xff]  ;;  %s164_s23 = scalar_lea.hbm %s217_s1, 16 }
  0x14   :  { %v27_v2 = vld [vmem:[#allocation2 + $0x10] sm:$0xff]  ;;  %v29_v3 = vld [vmem:[#allocation2 + $0x18] sm:$0xff]  ;;  %v31_v4 = vld [vmem:[#allocation2 + $0x20] sm:$0xff]  ;;  %p165_p8 = scmp.ne.s32.totalorder %s217_s1, %s164_s23  ;;  %p168_p9 = scmp.lt.u32.totalorder %s164_s23, %s217_s1 }
  0x15   :  { %v33_v5 = vld [vmem:[#allocation2 + $0x28] sm:$0xff]  ;;  %v49_v6 = vmul.f32 0.5, %v27_v2  ;;  %v35_v7 = vld [vmem:[#allocation2 + $0x30] sm:$0xff]  ;;  %v37_v8 = vld [vmem:[#allocation2 + $0x38] sm:$0xff]  ;;  %v38_v9 = vsub.f32 %v23_v0, %v31_v4  ;;  %v50_v11 = vmul.f32 0.5, %v29_v3 }
  0x16   :  { %v40_v10 = vsub.f32 %v25_v1, %v33_v5  ;;  %v43_v12 = vsub.f32 %v27_v2, %v35_v7  ;;  %v46_v13 = vsub.f32 %v29_v3, %v37_v8  ;;  %v51_v14 = vmul.f32 0.5, %v35_v7  ;;  %p170_p10 = pnand %p168_p9, %p165_p8 }
  0x17   :  { %v52_v15 = vmul.f32 0.5, %v37_v8  ;;  %v39_v16 = vand.u32 2147483647, %v38_v9  ;;  %v53_v18 = vsub.f32 %v23_v0, %v49_v6  ;;  %v54_v19 = vadd.f32 %v49_v6, %v23_v0 }
  0x18   :  { %v41_v17 = vand.u32 2147483647, %v40_v10  ;;  %v44_v20 = vand.u32 2147483647, %v43_v12  ;;  %v47_v21 = vand.u32 2147483647, %v46_v13  ;;  %v55_v22 = vsub.f32 %v25_v1, %v50_v11 }
  0x19   :  { %v56_v23 = vadd.f32 %v50_v11, %v25_v1  ;;  %v57_v25 = vsub.f32 %v31_v4, %v51_v14  ;;  %v58_v26 = vadd.f32 %v51_v14, %v31_v4  ;;  %v59_v27 = vsub.f32 %v33_v5, %v52_v15 }
  0x1a   :  { %v42_v24 = vadd.f32 %v41_v17, %v39_v16  ;;  %v60_v28 = vadd.f32 %v52_v15, %v33_v5  ;;  %v61_v29 = vsub.f32 %v54_v19, %v53_v18 }
  0x1b   :  { %v62_v30 = vsub.f32 %v56_v23, %v55_v22  ;;  %v64_v32 = vsub.f32 %v58_v26, %v57_v25  ;;  %v85_v33 = vmin.f32 %v55_v22, %v59_v27  ;;  %v67_v34 = vmin.f32 %v54_v19, %v58_v26 }
  0x1c   :  { %v45_v31 = vadd.f32 %v44_v20, %v42_v24  ;;  %v65_v35 = vsub.f32 %v60_v28, %v59_v27  ;;  %v84_v36 = vmax.f32 %v56_v23, %v60_v28  ;;  %v68_v38 = vmax.f32 %v53_v18, %v57_v25 }
  0x1d   :  { %v63_v37 = vmul.f32 %v62_v30, %v61_v29  ;;  %v71_v40 = vmin.f32 %v56_v23, %v60_v28  ;;  %v72_v41 = vmax.f32 %v55_v22, %v59_v27  ;;  %v80_v42 = vmax.f32 %v54_v19, %v58_v26 }
  0x1e   :  { %v48_v39 = vadd.f32 %v47_v21, %v45_v31  ;;  %v66_v43 = vmul.f32 %v65_v35, %v64_v32  ;;  %v69_v44 = vsub.f32 %v67_v34, %v68_v38  ;;  %v81_v45 = vmin.f32 %v53_v18, %v57_v25 }
  0x1f   :  { %v86_v46 = vsub.f32 %v84_v36, %v85_v33  ;;  %v73_v47 = vsub.f32 %v71_v40, %v72_v41 }
  0x20   :  { %93 = vadd.xlane.f32.xlu0 %v48_v39  ;;  %v70_v48 = vmax.f32 %v69_v44, 0.0  ;;  %v82_v49 = vsub.f32 %v80_v42, %v81_v45  ;;  %v76_v52 = vadd.f32 %v66_v43, %v63_v37 }
  0x21   :  { %v87_v50 = vmax.f32 %v86_v46, 0.0  ;;  %v74_v51 = vmax.f32 %v73_v47, 0.0 }
  0x22   :  { %v83_v53 = vmax.f32 %v82_v49, 0.0 }
  0x23   :  { %v75_v54 = vmul.f32 %v74_v51, %v70_v48 }
  0x24   :  { %v88_v55 = vmul.f32 %v87_v50, %v83_v53 }
  0x25   :  { %v77_v56 = vsub.f32 %v76_v52, %v75_v54 }
  0x26   :  { %138 = vrcp.f32 %v88_v55 }
  0x27   :  { %140 = vrcp.f32 %v77_v56  ;;  %v89_v57 = vsub.f32 %v88_v55, %v77_v56 }
  0x30   :  { %v139_v58 = vpop.eup %138 }
  0x31   :  { %v141_v59 = vpop.eup %140  ;;  %v91_v60 = vmul.f32 %v139_v58, %v89_v57 }
  0x32   :  { %v79_v61 = vmul.f32 %v141_v59, %v75_v54 }
  0x34   :  { %v92_v62 = vsub.f32 %v79_v61, %v91_v60 }
  0x36   :  { %v104_v63 = vsub.f32 1.0, %v92_v62 }
  0x38   :  { %105 = vadd.xlane.f32.xlu0 %v104_v63 }
  0xad   :  { %v94_v0 = vpop.xlane.xlu0 %93 }
  0xae   :  { %v95_v1 = vrot.slane %v94_v0, 4 }
  0xb0   :  { %v96_v2 = vadd.f32 %v95_v1, %v94_v0 }
  0xb2   :  { %v97_v3 = vrot.slane %v96_v2, 2 }
  0xb4   :  { %v98_v4 = vadd.f32 %v97_v3, %v96_v2 }
  0xb6   :  { %v99_v5 = vrot.slane %v98_v4, 1 }
  0xb8   :  { %v100_v6 = vadd.f32 %v99_v5, %v98_v4 }
  0xba   :  { %130 = vpush %v100_v6 }
  0xc5   :  { %v106_v7 = vpop.xlane.xlu0 %105 }
  0xc6   :  { %v107_v8 = vrot.slane %v106_v7, 4 }
  0xc8   :  { %v108_v9 = vadd.f32 %v107_v8, %v106_v7 }
  0xca   :  { %v109_v10 = vrot.slane %v108_v9, 2 }
  0xcc   :  { %v110_v11 = vadd.f32 %v109_v10, %v108_v9 }
  0xce   :  { %v111_v12 = vrot.slane %v110_v11, 1 }
  0xd0   :  { %v112_v13 = vadd.f32 %v111_v12, %v110_v11 }
  0xd2   :  { %132 = vpush %v112_v13 }
  0xeb   :  { %s131_s0 = spop %130 }
  0xec   :  { %103 = sst [smem:[#allocation5]] %s131_s0 }
 0x103   :  { %s133_s20 = spop %132 }
 0x104   :  { %115 = sst [smem:[#allocation5 + $0x1]] %s133_s20 }
 0x105   :  { %173 = shalt.err (!%p170_p10)
}
 0x106   :  { %s181_s28 = smov [#allocation5]  }
 0x107   :  { %123 = dma.smem_to_hbm %s181_s28, 16, %s217_s1, [#allocation4]  }
 0x108   :  { %176 = dma.done.wait [#allocation4], 16  }
 0x109   :  { %177 = vsyncadd [#allocation4], 4294967280 }
 0x10a   :  { %127 = sfence }
 0x10b   :  { %128 = vsyncpa [#allocation3], 1 }
 0x10c   :  { %129 = vsyncpa [#allocation4], 1 }

</bundles_post_ra>
